<compile_context>
chip_gen: v7x
topology: tpu7x:2x2x1
jax: 0.10.0
libtpu: 0.0.40
codegen_flags: <defaults>
</compile_context>

<pallas_src>
import jax
import jax.numpy as jnp
from jax.experimental import pallas as pl
from jax.experimental.pallas import tpu as pltpu

GRID_SIZE = 25
IN_FEATS = GRID_SIZE * GRID_SIZE     # 625
HID1 = 256
HID2 = 128
MAX_BATCH_TILE = 2048                # ~6 MB of HBM traffic per grid step


def _pick_batch_tile(n):
    """Largest power-of-two tile <= MAX_BATCH_TILE keeping >= 4 grid steps
    whenever the batch allows it (>= 2 steps per TC when the parallel axis is
    sharded across v7x's two TensorCores), floored at 8 sublanes (f32)."""
    tile = 8
    while tile < MAX_BATCH_TILE and n >= 4 * (2 * tile):
        tile *= 2
    return tile


def _facegrid_mlp_kernel(x_ref, w1_ref, b1_ref, w2_ref, b2_ref, o_ref):
    # In-kernel bf16 cast (free VPU work hidden under the x DMA).
    x = x_ref[...].astype(jnp.bfloat16)
    # Layer 1: bf16 MXU matmul (K=625, masked/padded internally), f32 acc.
    h = jnp.dot(x, w1_ref[...], preferred_element_type=jnp.float32)
    h = jnp.maximum(h + b1_ref[...], 0.0)
    # Layer 2: cast activations to bf16 for the MXU, accumulate in f32.
    o = jnp.dot(h.astype(jnp.bfloat16), w2_ref[...],
                preferred_element_type=jnp.float32)
    o_ref[...] = jnp.maximum(o + b2_ref[...], 0.0).astype(o_ref.dtype)


def prepare_params(w1, b1, w2, b2):
    """One-time weight prep, hoisted out of the per-call path.

    w1: (625, 256), b1: (256,), w2: (256, 128), b2: (128,)  f32
    (weights stored (in_features, out_features), i.e. transposed from PyTorch).
    Returns bf16 MXU weights and (1, F) f32 bias rows.
    """
    return (w1.astype(jnp.bfloat16),
            b1.reshape(1, HID1).astype(jnp.float32),
            w2.astype(jnp.bfloat16),
            b2.reshape(1, HID2).astype(jnp.float32))


@jax.jit
def facegrid_forward(x, w1_bf16, b1_row, w2_bf16, b2_row):
    """x: (N, 25, 25) or (N, 625) float32. Returns (N, 128) float32."""
    n = x.shape[0]
    x2 = x.reshape(n, -1)                       # x.view(x.size(0), -1)
    assert x2.shape[1] == IN_FEATS

    tile = _pick_batch_tile(n)
    grid = (pl.cdiv(n, tile),)

    flops = 2 * n * (IN_FEATS * HID1 + HID1 * HID2)
    bytes_accessed = (n * (IN_FEATS * 4 + HID2 * 4)               # x in, out
                      + (IN_FEATS * HID1 + HID1 * HID2) * 2       # bf16 weights
                      + (HID1 + HID2) * 4)                        # f32 biases

    out = pl.pallas_call(
        _facegrid_mlp_kernel,
        out_shape=jax.ShapeDtypeStruct((n, HID2), jnp.float32),
        grid_spec=pltpu.PrefetchScalarGridSpec(
            num_scalar_prefetch=0,
            grid=grid,
            in_specs=[
                # Last dim 625 == full array dim, so the (8,128) rule is
                # satisfied; only the batch axis is tiled.
                pl.BlockSpec((tile, IN_FEATS), lambda i: (i, 0)),
                # Constant index maps: fetched once, VMEM-resident across
                # all grid steps.  (Default double-buffering kept: the extra
                # ~0.4 MB is negligible against the 32 MiB budget.)
                pl.BlockSpec((IN_FEATS, HID1), lambda i: (0, 0)),
                pl.BlockSpec((1, HID1), lambda i: (0, 0)),
                pl.BlockSpec((HID1, HID2), lambda i: (0, 0)),
                pl.BlockSpec((1, HID2), lambda i: (0, 0)),
            ],
            # Lane-dense (128-wide) output; ragged final block's store is
            # masked by Pallas (no cross-row reduction, so garbage rows in a
            # partial input block never reach valid outputs).
            out_specs=pl.BlockSpec((tile, HID2), lambda i: (i, 0)),
        ),
        compiler_params=pltpu.CompilerParams(
            dimension_semantics=("parallel",),
            # tile=2048: 2*(x 5.12 MB + out 1.0 MB) + ~0.9 MB weights +
            # ~6.6 MB body temporaries ~= 20 MB  ->  32 MiB limit gives
            # headroom on every generation and stays well under v7x's
            # 64 MiB physical VMEM.
            vmem_limit_bytes=32 * 1024 * 1024),
        cost_estimate=pl.CostEstimate(
            flops=flops, transcendentals=0, bytes_accessed=bytes_accessed),
    )(x2, w1_bf16, b1_row, w2_bf16, b2_row)

    return out


def init_params(key):
    """Deterministic synthetic init (PyTorch-Linear-style uniform bounds)."""
    k1, k2, k3, k4 = jax.random.split(key, 4)
    bound1 = 1.0 / jnp.sqrt(IN_FEATS)
    bound2 = 1.0 / jnp.sqrt(HID1)
    w1 = jax.random.uniform(k1, (IN_FEATS, HID1), jnp.float32, -bound1, bound1)
    b1 = jax.random.uniform(k2, (HID1,), jnp.float32, -bound1, bound1)
    w2 = jax.random.uniform(k3, (HID1, HID2), jnp.float32, -bound2, bound2)
    b2 = jax.random.uniform(k4, (HID2,), jnp.float32, -bound2, bound2)
    return w1, b1, w2, b2


def _reference(x, w1, b1, w2, b2):
    """Pure-JAX f32 reference of the same forward."""
    xf = x.reshape(x.shape[0], -1)
    return jnp.maximum(jnp.maximum(xf @ w1 + b1, 0.0) @ w2 + b2, 0.0)


if __name__ == "__main__":
    key = jax.random.PRNGKey(0)
    kx1, kx2, kp = jax.random.split(key, 3)

    w1, b1, w2, b2 = init_params(kp)
    params = prepare_params(w1, b1, w2, b2)

    # 1) Small smoke test: batch=2, single (partial) block.
    x_small = jax.random.uniform(kx1, (2, GRID_SIZE, GRID_SIZE), jnp.float32)
    out_small = jax.block_until_ready(facegrid_forward(x_small, *params))
    ref_small = _reference(x_small, w1, b1, w2, b2)
    assert out_small.shape == (2, HID2)
    assert jnp.allclose(out_small, ref_small, atol=3e-2, rtol=3e-2), \
        "mismatch vs reference (batch=2)"

    # 2) Multi-step + ragged final block: N=1000 -> tile=128, 8 grid steps,
    #    last block partial (exercises the masked-writeback path).
    x_big = jax.random.uniform(kx2, (1000, GRID_SIZE, GRID_SIZE), jnp.float32)
    out_big = jax.block_until_ready(facegrid_forward(x_big, *params))
    ref_big = _reference(x_big, w1, b1, w2, b2)
    assert out_big.shape == (1000, HID2)
    assert jnp.allclose(out_big, ref_big, atol=3e-2, rtol=3e-2), \
        "mismatch vs reference (batch=1000)"

    print("KERNEL_OK")
</pallas_src>

<mosaic_0001>
module attributes {stable_mosaic.version = 11 : i64} {
  func.func @_facegrid_mlp_kernel(%arg0: i32, %arg1: memref<8x625xf32, #tpu.memory_space<vmem>>, %arg2: memref<625x256xbf16, #tpu.memory_space<vmem>>, %arg3: memref<1x256xf32, #tpu.memory_space<vmem>>, %arg4: memref<256x128xbf16, #tpu.memory_space<vmem>>, %arg5: memref<1x128xf32, #tpu.memory_space<vmem>>, %arg6: memref<8x128xf32, #tpu.memory_space<vmem>>) attributes {dimension_semantics = [#tpu.dimension_semantics<parallel>], iteration_bounds = array<i64: 1>, scalar_prefetch = 0 : i64, scratch_operands = 0 : i64, tpu.core_type = #tpu.core_type<tc>, window_params = [{transform_indices = @transform_0, window_bounds = array<i64: 8, 625>}, {pipeline_mode = #tpu.pipeline_mode<synchronous>, transform_indices = @transform_1, window_bounds = array<i64: 625, 256>}, {pipeline_mode = #tpu.pipeline_mode<synchronous>, transform_indices = @transform_2, window_bounds = array<i64: 1, 256>}, {pipeline_mode = #tpu.pipeline_mode<synchronous>, transform_indices = @transform_3, window_bounds = array<i64: 256, 128>}, {pipeline_mode = #tpu.pipeline_mode<synchronous>, transform_indices = @transform_4, window_bounds = array<i64: 1, 128>}, {transform_indices = @transform_5, window_bounds = array<i64: 8, 128>}]} {
    %c0 = arith.constant 0 : index
    %c0_0 = arith.constant 0 : index
    %0 = vector.load %arg1[%c0, %c0_0] : memref<8x625xf32, #tpu.memory_space<vmem>>, vector<8x625xf32>
    %1 = arith.truncf %0 : vector<8x625xf32> to vector<8x625xbf16>
    %c0_1 = arith.constant 0 : index
    %c0_2 = arith.constant 0 : index
    %2 = vector.load %arg2[%c0_1, %c0_2] : memref<625x256xbf16, #tpu.memory_space<vmem>>, vector<625x256xbf16>
    %cst = arith.constant dense<0.000000e+00> : vector<8x256xf32>
    %3 = tpu.matmul %1, %2, %cst {dimension_numbers = #tpu.dot_dimension_numbers<[1], [0], [0], [1], [0, 0, 1, 1], [], []>} : vector<8x625xbf16>, vector<625x256xbf16>, vector<8x256xf32> -> vector<8x256xf32>
    %c0_3 = arith.constant 0 : index
    %c0_4 = arith.constant 0 : index
    %4 = vector.load %arg3[%c0_3, %c0_4] : memref<1x256xf32, #tpu.memory_space<vmem>>, vector<1x256xf32>
    %5 = vector.broadcast %4 : vector<1x256xf32> to vector<8x256xf32>
    %6 = arith.addf %3, %5 : vector<8x256xf32>
    %cst_5 = arith.constant 0.000000e+00 : f32
    %7 = vector.broadcast %cst_5 : f32 to vector<8x256xf32>
    %8 = arith.maximumf %6, %7 : vector<8x256xf32>
    %9 = arith.truncf %8 : vector<8x256xf32> to vector<8x256xbf16>
    %c0_6 = arith.constant 0 : index
    %c0_7 = arith.constant 0 : index
    %10 = vector.load %arg4[%c0_6, %c0_7] : memref<256x128xbf16, #tpu.memory_space<vmem>>, vector<256x128xbf16>
    %cst_8 = arith.constant dense<0.000000e+00> : vector<8x128xf32>
    %11 = tpu.matmul %9, %10, %cst_8 {dimension_numbers = #tpu.dot_dimension_numbers<[1], [0], [0], [1], [0, 0, 1, 1], [], []>} : vector<8x256xbf16>, vector<256x128xbf16>, vector<8x128xf32> -> vector<8x128xf32>
    %c0_9 = arith.constant 0 : index
    %c0_10 = arith.constant 0 : index
    %12 = vector.load %arg5[%c0_9, %c0_10] : memref<1x128xf32, #tpu.memory_space<vmem>>, vector<1x128xf32>
    %13 = vector.broadcast %12 : vector<1x128xf32> to vector<8x128xf32>
    %14 = arith.addf %11, %13 : vector<8x128xf32>
    %cst_11 = arith.constant 0.000000e+00 : f32
    %15 = vector.broadcast %cst_11 : f32 to vector<8x128xf32>
    %16 = arith.maximumf %14, %15 : vector<8x128xf32>
    %c0_12 = arith.constant 0 : index
    %c0_13 = arith.constant 0 : index
    %17 = vector.load %arg6[%c0_12, %c0_13] : memref<8x128xf32, #tpu.memory_space<vmem>>, vector<8x128xf32>
    tpu.vector_store %arg6[%c0_12, %c0_13], %16 {strides = array<i32>} : memref<8x128xf32, #tpu.memory_space<vmem>>, vector<8x128xf32>,
    return
  }
  func.func @transform_0(%arg0: i32) -> (i32, i32) {
    %c0_i32 = arith.constant 0 : i32
    %c0_i32_0 = arith.constant 0 : i32
    return %arg0, %c0_i32 : i32, i32
  }
  func.func @transform_1(%arg0: i32) -> (i32, i32) {
    %c0_i32 = arith.constant 0 : i32
    %c0_i32_0 = arith.constant 0 : i32
    %c0_i32_1 = arith.constant 0 : i32
    return %c0_i32, %c0_i32_0 : i32, i32
  }
  func.func @transform_2(%arg0: i32) -> (i32, i32) {
    %c0_i32 = arith.constant 0 : i32
    %c0_i32_0 = arith.constant 0 : i32
    %c0_i32_1 = arith.constant 0 : i32
    return %c0_i32, %c0_i32_0 : i32, i32
  }
  func.func @transform_3(%arg0: i32) -> (i32, i32) {
    %c0_i32 = arith.constant 0 : i32
    %c0_i32_0 = arith.constant 0 : i32
    %c0_i32_1 = arith.constant 0 : i32
    return %c0_i32, %c0_i32_0 : i32, i32
  }
  func.func @transform_4(%arg0: i32) -> (i32, i32) {
    %c0_i32 = arith.constant 0 : i32
    %c0_i32_0 = arith.constant 0 : i32
    %c0_i32_1 = arith.constant 0 : i32
    return %c0_i32, %c0_i32_0 : i32, i32
  }
  func.func @transform_5(%arg0: i32) -> (i32, i32) {
    %c0_i32 = arith.constant 0 : i32
    %c0_i32_0 = arith.constant 0 : i32
    return %arg0, %c0_i32 : i32, i32
  }
}

</mosaic_0001>

<bundles_post_ra>
// kernel: facegrid_forward.1
= control target key start
LH: loop header
LB: loop body
LE: loop exit
PB: predicated region body
PF: predicated region fallthrough
CT: control target
= control target key end

     0   :  { %10 = vsyncpa [#allocation3], 0  ;;  %s1409_s0 = inlined_call_operand.vmem [shape: f32[2,625], index: 0, kind: input, shape index: {}]   ;;  %s1410_s1 = inlined_call_operand.hbm [shape: bf16[625,256], index: 1, kind: input, shape index: {}]   ;;  %s1411_s2 = inlined_call_operand.vmem [shape: f32[1,256], index: 2, kind: input, shape index: {}]   ;;  %s1412_s3 = inlined_call_operand.vmem [shape: bf16[256,128], index: 3, kind: input, shape index: {}]   ;;  %s1413_s4 = inlined_call_operand.vmem [shape: f32[1,128], index: 4, kind: input, shape index: {}]   ;;  %s1414_s5 = inlined_call_operand.hbm [shape: f32[2,128], index: 5, kind: output, shape index: {}]  }
   0x1   :  { %11 = vsyncpa [#allocation4], 0  ;;  %s1262_s18 = smov [#allocation2]   ;;  %s1214_s22 = scalar_lea.hbm %s1410_s1, 10112 }
   0x2   :  { %s19_s19 = sshll.u32 %s1262_s18, 4  ;;  %p1215_p0 = scmp.ne.s32.totalorder %s1410_s1, %s1214_s22  ;;  %s20_s19 = int_to_ptr.vmem [resolvable:$true] %s19_s19 }
   0x3   :  { %p1218_p1 = scmp.lt.u32.totalorder %s1214_s22, %s1410_s1 }
   0x5   :  { %p1220_p2 = pnand %p1218_p1, %p1215_p0 }
   0x7   :  { %1223 = shalt.err (!%p1220_p2)
}
   0x8   :  { %s1224_s27 = scalar_lea.vmem %s20_s19, 10112  ;;  %p1229_p4 = scmp.lt.s32.totalorder %s20_s19, %s20_s19 }
   0x9   :  { %p1225_p3 = scmp.ne.s32.totalorder %s20_s19, %s1224_s27  ;;  %p1230_p5 = scmp.lt.s32.totalorder %s1224_s27, %s1224_s27 }
   0xb   :  { %p1231_p6 = por %p1230_p5, %p1229_p4 }
   0xd   :  { %p1232_p7 = pnand %p1231_p6, %p1225_p3 }
   0xf   :  { %1235 = shalt.err (!%p1232_p7)
}
  0x10   :  { %s1263_s28 = smov 128   ;;  %s1264_s29 = smov 8  }
  0x11   :  { %25 = dma.hbm_to_vmem [thread:$0]  %s1410_s1, 10112, %s20_s19, [#allocation3], %s1263_s28, %s1263_s28, %s1264_s29  }
  0x12   :  { %1258 = dma.done.wait [#allocation3], 10112  }
  0x13   :  { %1259 = vsyncadd [#allocation3], 4294957184  ;;  %v1071_v0 = vld [vmem:[#allocation2 + $0x104] ss:$8 sps:$4 sm:$0xff]   ;;  %v1073_v1 = vld [vmem:[#allocation2 + $0x100] ss:$8 sps:$4 sm:$0xff]   ;;  %v59_v28 = vlaneseq }
  0x14   :  { %655 = vmatprep.subr.bf16.mxu0 %v1071_v0  ;;  %v1074_v2 = vld [vmem:[#allocation2 + $0x114] ss:$8 sps:$4 sm:$0xff]   ;;  %v1076_v3 = vld [vmem:[#allocation2 + $0x110] ss:$8 sps:$4 sm:$0xff]   ;;  %v1077_v4 = vld [vmem:[#allocation2 + $0x124] ss:$8 sps:$4 sm:$0xff]  }
  0x15   :  { %656 = vmatpush1.bf16.msra.mxu0 %v1073_v1  ;;  %v1079_v5 = vld [vmem:[#allocation2 + $0x120] ss:$8 sps:$4 sm:$0xff]   ;;  %v1080_v6 = vld [vmem:[#allocation2 + $0x134] ss:$8 sps:$4 sm:$0xff]   ;;  %v1092_v7 = vld [vmem:[#allocation2 + $0x4] ss:$8 sps:$4 sm:$0xff]  }
  0x16   :  { %657 = vmatprep.subr.bf16.mxu0 %v1074_v2  ;;  %v1094_v8 = vld [vmem:[#allocation2] ss:$8 sps:$4 sm:$0xff]   ;;  %v1082_v9 = vld [vmem:[#allocation2 + $0x130] ss:$8 sps:$4 sm:$0xff]   ;;  %v1083_v10 = vld [vmem:[#allocation2 + $0x144] ss:$8 sps:$4 sm:$0xff]   ;;  %614 = vmatprep.subr.bf16.mxu1 %v1092_v7 }
  0x17   :  { %v1098_v11 = vld [vmem:[#allocation2 + $0x14] ss:$8 sps:$4 sm:$0xff]   ;;  %615 = vmatpush1.bf16.msra.mxu1 %v1094_v8  ;;  %v1100_v12 = vld [vmem:[#allocation2 + $0x10] ss:$8 sps:$4 sm:$0xff]   ;;  %v1085_v13 = vld [vmem:[#allocation2 + $0x140] ss:$8 sps:$4 sm:$0xff]  }
  0x18   :  { %616 = vmatprep.subr.bf16.mxu1 %v1098_v11  ;;  %v1104_v14 = vld [vmem:[#allocation2 + $0x24] ss:$8 sps:$4 sm:$0xff]   ;;  %v1086_v15 = vld [vmem:[#allocation2 + $0x154] ss:$8 sps:$4 sm:$0xff]   ;;  %v1106_v16 = vld [vmem:[#allocation2 + $0x20] ss:$8 sps:$4 sm:$0xff]  }
  0x19   :  { %658 = vmatpush1.bf16.msra.mxu0 %v1076_v3  ;;  %v1110_v17 = vld [vmem:[#allocation2 + $0x34] ss:$8 sps:$4 sm:$0xff]   ;;  %v1088_v18 = vld [vmem:[#allocation2 + $0x150] ss:$8 sps:$4 sm:$0xff]   ;;  %v1089_v19 = vld [vmem:[#allocation2 + $0x164] ss:$8 sps:$4 sm:$0xff]  }
  0x1a   :  { %659 = vmatprep.subr.bf16.mxu0 %v1077_v4  ;;  %v1112_v20 = vld [vmem:[#allocation2 + $0x30] ss:$8 sps:$4 sm:$0xff]   ;;  %v1116_v21 = vld [vmem:[#allocation2 + $0x44] ss:$8 sps:$4 sm:$0xff]   ;;  %v1091_v22 = vld [vmem:[#allocation2 + $0x160] ss:$8 sps:$4 sm:$0xff]  }
  0x1b   :  { %617 = vmatpush1.bf16.msra.mxu1 %v1100_v12  ;;  %v1095_v23 = vld [vmem:[#allocation2 + $0x174] ss:$8 sps:$4 sm:$0xff]   ;;  %v1118_v24 = vld [vmem:[#allocation2 + $0x40] ss:$8 sps:$4 sm:$0xff]   ;;  %v1265_v26 = vmov 1983009808  }
  0x1c   :  { %618 = vmatprep.subr.bf16.mxu1 %v1104_v14  ;;  %v1122_v25 = vld [vmem:[#allocation2 + $0x54] ss:$8 sps:$4 sm:$0xff]   ;;  %v57_v27 = vunpack.c.l.s4 %v1265_v26  ;;  %v1097_v29 = vld [vmem:[#allocation2 + $0x170] ss:$8 sps:$4 sm:$0xff]   ;;  %v1101_v30 = vld [vmem:[#allocation2 + $0x184] ss:$8 sps:$4 sm:$0xff]  }
  0x1d   :  { %660 = vmatpush1.bf16.msra.mxu0 %v1079_v5  ;;  %v1124_v31 = vld [vmem:[#allocation2 + $0x50] ss:$8 sps:$4 sm:$0xff]   ;;  %v1128_v32 = vld [vmem:[#allocation2 + $0x64] ss:$8 sps:$4 sm:$0xff]   ;;  %v1312_v34 = vshrl.u32 %v59_v28, 7  ;;  %vm605_vm0 = vcmask 1040384  }
  0x1e   :  { %661 = vmatprep.subr.bf16.mxu0 %v1080_v6  ;;  %v58_v33 = vunpack.c.0.s8 %v57_v27  ;;  %v1103_v35 = vld [vmem:[#allocation2 + $0x180] ss:$8 sps:$4 sm:$0xff]   ;;  %v1107_v36 = vld [vmem:[#allocation2 + $0x194] ss:$8 sps:$4 sm:$0xff]   ;;  %v1109_v37 = vld [vmem:[#allocation2 + $0x190] ss:$8 sps:$4 sm:$0xff]  }
  0x1f   :  { %619 = vmatpush1.bf16.msra.mxu1 %v1106_v16  ;;  %v1130_v38 = vld [vmem:[#allocation2 + $0x60] ss:$8 sps:$4 sm:$0xff]   ;;  %v1113_v39 = vld [vmem:[#allocation2 + $0x1a4] ss:$8 sps:$4 sm:$0xff]   ;;  %v1134_v40 = vld [vmem:[#allocation2 + $0x74] ss:$8 sps:$4 sm:$0xff]  }
  0x20   :  { %620 = vmatprep.subr.bf16.mxu1 %v1110_v17  ;;  %v1315_v41 = vsub.s32 %v58_v33, %v1312_v34  ;;  %v1149_v42 = vld [vmem:[%s1409_s0 + $0x4] ss:$10 sps:$4 sm:$0xff]   ;;  %v1115_v48 = vld [vmem:[#allocation2 + $0x1a0] ss:$8 sps:$4 sm:$0xff]   ;;  %v1119_v49 = vld [vmem:[#allocation2 + $0x1b4] ss:$8 sps:$4 sm:$0xff]  }
  0x21   :  { %662 = vmatpush1.bf16.msra.mxu0 %v1082_v9  ;;  %v1151_v43 = vld [vmem:[%s1409_s0 + $0x18] ss:$10 sps:$4 sm:$0xff]   ;;  %v1146_v52 = vld [vmem:[#allocation2 + $0x94] ss:$8 sps:$4 sm:$0xff]   ;;  %vm601_vm1 = vcmask 924672  }
  0x22   :  { %663 = vmatprep.subr.bf16.mxu0 %v1083_v10  ;;  %v1136_v44 = vld [vmem:[#allocation2 + $0x70] ss:$8 sps:$4 sm:$0xff]   ;;  %v1140_v45 = vld [vmem:[#allocation2 + $0x84] ss:$8 sps:$4 sm:$0xff]   ;;  %v69_v46 = vrot.slane %v1149_v42, %v1315_v41  ;;  %v83_v47 = vrot.slane %v1151_v43, %v1315_v41  ;;  %v1142_v51 = vld [vmem:[#allocation2 + $0x80] ss:$8 sps:$4 sm:$0xff]  }
  0x23   :  { %621 = vmatpush1.bf16.msra.mxu1 %v1112_v20  ;;  %v1121_v54 = vld [vmem:[#allocation2 + $0x1b0] ss:$8 sps:$4 sm:$0xff]   ;;  %v1125_v55 = vld [vmem:[#allocation2 + $0x1c4] ss:$8 sps:$4 sm:$0xff]   ;;  %v1127_v58 = vld [vmem:[#allocation2 + $0x1c0] ss:$8 sps:$4 sm:$0xff]  }
  0x24   :  { %622 = vmatprep.subr.bf16.mxu1 %v1116_v21  ;;  %v87_v50 = vcombine.high %v69_v46, %v83_v47  ;;  %v1148_v56 = vld [vmem:[#allocation2 + $0x90] ss:$8 sps:$4 sm:$0xff]   ;;  %v1156_v57 = vld [vmem:[#allocation2 + $0xa4] ss:$8 sps:$4 sm:$0xff]   ;;  %v1131_v59 = vld [vmem:[#allocation2 + $0x1d4] ss:$8 sps:$4 sm:$0xff]   ;;  %v86_v10 = vcombine.low %v69_v46, %v83_v47 }
  0x25   :  { %664 = vmatpush1.bf16.msra.mxu0 %v1085_v13  ;;  %v1158_v60 = vld [vmem:[#allocation2 + $0xa0] ss:$8 sps:$4 sm:$0xff]   ;;  %v1162_v61 = vld [vmem:[#allocation2 + $0xb4] ss:$8 sps:$4 sm:$0xff]   ;;  %v1133_v62 = vld [vmem:[#allocation2 + $0x1d0] ss:$8 sps:$4 sm:$0xff]  }
  0x26   :  { %665 = vmatprep.subr.bf16.mxu0 %v1086_v15  ;;  %v113_v53 = vpack.c.bf16 %v87_v50, %v87_v50  ;;  %v1137_v63 = vld [vmem:[#allocation2 + $0x1e4] ss:$8 sps:$4 sm:$0xff]   ;;  %v1139_v0 = vld [vmem:[#allocation2 + $0x1e0] ss:$8 sps:$4 sm:$0xff]   ;;  %v1164_v1 = vld [vmem:[#allocation2 + $0xb0] ss:$8 sps:$4 sm:$0xff]   ;;  %v112_v16 = vpack.c.bf16 %v86_v10, %v86_v10 }
  0x27   :  { %623 = vmatpush1.bf16.msra.mxu1 %v1118_v24  ;;  %v1168_v2 = vld [vmem:[#allocation2 + $0xc4] ss:$8 sps:$4 sm:$0xff]   ;;  %v1193_v4 = vld [vmem:[%s1409_s0 + $0x14] ss:$10 sps:$4 sm:$0xff]   ;;  %v1145_v12 = vld [vmem:[#allocation2 + $0x1f0] ss:$8 sps:$4 sm:$0xff]  }
  0x28   :  { %624 = vmatprep.subr.bf16.mxu1 %v1122_v25  ;;  %687 = vmatprep.mubr.bf16.mxu0 %v113_v53  ;;  %v1192_v3 = vld [vmem:[%s1409_s0] ss:$10 sps:$4 sm:$0xff]   ;;  %v1143_v5 = vld [vmem:[#allocation2 + $0x1f4] ss:$8 sps:$4 sm:$0xff]   ;;  %v76_v7 = vrot.slane %v1193_v4, %v1315_v41  ;;  %v1176_v15 = vld [vmem:[#allocation2 + $0xd0] ss:$8 sps:$4 sm:$0xff]  }
  0x29   :  { %666 = vmatpush1.bf16.msra.mxu0 %v1088_v18  ;;  %v62_v6 = vrot.slane %v1192_v3, %v1315_v41  ;;  %v1170_v8 = vld [vmem:[#allocation2 + $0xc0] ss:$8 sps:$4 sm:$0xff]   ;;  %v1174_v9 = vld [vmem:[#allocation2 + $0xd4] ss:$8 sps:$4 sm:$0xff]   ;;  %v1155_v13 = vld [vmem:[#allocation2 + $0x204] ss:$8 sps:$4 sm:$0xff]  }
  0x2a   :  { %667 = vmatprep.subr.bf16.mxu0 %v1089_v19  ;;  %v1180_v17 = vld [vmem:[#allocation2 + $0xe4] ss:$8 sps:$4 sm:$0xff]   ;;  %v1153_v18 = vld [vmem:[#allocation2 + $0x200] ss:$8 sps:$4 sm:$0xff]   ;;  %v1161_v19 = vld [vmem:[#allocation2 + $0x214] ss:$8 sps:$4 sm:$0xff]  }
  0x2b   :  { %625 = vmatpush1.bf16.msra.mxu1 %v1124_v31  ;;  %v85_v11 = vcombine.high %v62_v6, %v76_v7  ;;  %v1159_v20 = vld [vmem:[#allocation2 + $0x210] ss:$8 sps:$4 sm:$0xff]   ;;  %v1182_v21 = vld [vmem:[#allocation2 + $0xe0] ss:$8 sps:$4 sm:$0xff]   ;;  %v1266_v25 = vmov 0   ;;  %v84_v26 = vcombine.low %v62_v6, %v76_v7  ;;  %v198_v6 = vsub.s32 0, %v1312_v34 }
  0x2c   :  { %626 = vmatprep.subr.bf16.mxu1 %v1128_v32  ;;  %v1188_v24 = vld [vmem:[#allocation2 + $0xf0] ss:$8 sps:$4 sm:$0xff]   ;;  %v1198_v27 = vld [vmem:[%s1412_s3 + $0x40] sm:$0xff]   ;;  %v1200_v32 = vld [vmem:[%s1412_s3 + $0x48] sm:$0xff]  }
  0x2d   :  { %668 = vmatpush1.bf16.msra.mxu0 %v1091_v22  ;;  %v111_v14 = vpack.c.bf16 %v85_v11, %v85_v11  ;;  %v1167_v22 = vld [vmem:[#allocation2 + $0x224] ss:$8 sps:$4 sm:$0xff]   ;;  %v1165_v28 = vld [vmem:[#allocation2 + $0x220] ss:$8 sps:$4 sm:$0xff]   ;;  %v1171_v33 = vld [vmem:[#allocation2 + $0x230] ss:$8 sps:$4 sm:$0xff]  }
  0x2e   :  { %669 = vmatprep.subr.bf16.mxu0 %v1095_v23  ;;  %v1186_v23 = vld [vmem:[#allocation2 + $0xf4] ss:$8 sps:$4 sm:$0xff]   ;;  %v1199_v31 = vld [vmem:[%s1412_s3] sm:$0xff]   ;;  %v1196_v42 = vld [vmem:[%s1409_s0 + $0x8] ss:$10 sps:$4 sm:$0x33]  }
  0x2f   :  { %627 = vmatpush1.bf16.msra.mxu1 %v1130_v38  ;;  %646 = vmatprep.mubr.bf16.mxu1 %v111_v14  ;;  %v1177_v38 = vld [vmem:[#allocation2 + $0x240] ss:$8 sps:$4 sm:$0xff]   ;;  %v1203_v43 = vld [vmem:[%s1412_s3 + $0x10] sm:$0xff]   ;;  %v1191_v47 = vld [vmem:[#allocation2 + $0x264] ss:$8 sps:$4 sm:$0xff]  }
  0x30   :  { %628 = vmatprep.subr.bf16.mxu1 %v1134_v40  ;;  %v193_v40 = vld [vmem:[#allocation2 + $0x270] sm:$0x11]  ;;  %v1205_v50 = vld [vmem:[%s1412_s3 + $0x18] sm:$0xff]   ;;  %v1206_v53 = vld [vmem:[%s1412_s3 + $0x60] sm:$0xff]  }
  0x31   :  { %670 = vmatpush1.bf16.msra.mxu0 %v1097_v29  ;;  %v1173_v29 = vld [vmem:[#allocation2 + $0x234] ss:$8 sps:$4 sm:$0xff]   ;;  %v1183_v46 = vld [vmem:[#allocation2 + $0x250] ss:$8 sps:$4 sm:$0xff]   ;;  %v194_v7 = vld [vmem:[%s1411_s2] sm:$0x3] }
  0x32   :  { %671 = vmatprep.subr.bf16.mxu0 %v1101_v30  ;;  %v110_v30 = vpack.c.bf16 %v84_v26, %v84_v26 }
  0x33   :  { %629 = vmatpush1.bf16.msra.mxu1 %v1136_v44  ;;  %v1197_v44 = vld [vmem:[%s1409_s0 + $0x1c] ss:$10 sps:$4 sm:$0x33]  }
  0x34   :  { %630 = vmatprep.subr.bf16.mxu1 %v1140_v45  ;;  %v1204_v45 = vld [vmem:[%s1412_s3 + $0x58] sm:$0xff]  }
  0x35   :  { %672 = vmatpush1.bf16.msra.mxu0 %v1103_v35  ;;  %v1179_v35 = vld [vmem:[#allocation2 + $0x244] ss:$8 sps:$4 sm:$0xff]  }
  0x36   :  { %673 = vmatprep.subr.bf16.mxu0 %v1107_v36  ;;  %v1201_v36 = vld [vmem:[%s1412_s3 + $0x8] sm:$0xff]  }
  0x37   :  { %631 = vmatpush1.bf16.msra.mxu1 %v1142_v51  ;;  %v96_v51 = vrot.slane %v1196_v42, %v1315_v41 }
  0x38   :  { %632 = vmatprep.subr.bf16.mxu1 %v1146_v52  ;;  %v103_v52 = vrot.slane %v1197_v44, %v1315_v41 }
  0x39   :  { %674 = vmatpush1.bf16.msra.mxu0 %v1109_v37  ;;  %v1202_v37 = vld [vmem:[%s1412_s3 + $0x50] sm:$0xff]  }
  0x3a   :  { %675 = vmatprep.subr.bf16.mxu0 %v1113_v39  ;;  %v1185_v39 = vld [vmem:[#allocation2 + $0x254] ss:$8 sps:$4 sm:$0xff]  }
  0x3b   :  { %633 = vmatpush1.bf16.msra.mxu1 %v1148_v56 }
  0x3c   :  { %634 = vmatprep.subr.bf16.mxu1 %v1156_v57  ;;  %v1207_v57 = vld [vmem:[%s1412_s3 + $0x20] sm:$0xff]  }
  0x3d   :  { %676 = vmatpush1.bf16.msra.mxu0 %v1115_v48  ;;  %v1014_v48 = vcombine.high %v193_v40, %v193_v40 }
  0x3e   :  { %677 = vmatprep.subr.bf16.mxu0 %v1119_v49  ;;  %v607_v49 = vsel %vm605_vm0, 65535, %v1266_v25 }
  0x3f   :  { %635 = vmatpush1.bf16.msra.mxu1 %v1158_v60  ;;  %v612_v56 = vand.u32 %v1014_v48, %v607_v49  ;;  %v1208_v60 = vld [vmem:[%s1412_s3 + $0x68] sm:$0xff]  }
  0x40   :  { %636 = vmatprep.subr.bf16.mxu1 %v1162_v61  ;;  %v1209_v61 = vld [vmem:[%s1412_s3 + $0x28] sm:$0xff]  }
  0x41   :  { %678 = vmatpush1.bf16.msra.mxu0 %v1121_v54  ;;  %v1189_v54 = vld [vmem:[#allocation2 + $0x260] ss:$8 sps:$4 sm:$0xff]  }
  0x42   :  { %679 = vmatprep.subr.bf16.mxu0 %v1125_v55  ;;  %v1013_v55 = vcombine.low %v193_v40, %v193_v40 }
  0x43   :  { %637 = vmatpush1.bf16.msra.mxu1 %v1164_v1  ;;  %v1213_v1 = vld [vmem:[%s1412_s3 + $0x38] sm:$0xff]  }
  0x44   :  { %638 = vmatprep.subr.bf16.mxu1 %v1168_v2 }
  0x45   :  { %680 = vmatpush1.bf16.msra.mxu0 %v1127_v58  ;;  %v104_v58 = vcombine.low %v96_v51, %v103_v52 }
  0x46   :  { %681 = vmatprep.subr.bf16.mxu0 %v1131_v59  ;;  %v609_v59 = vand.u32 %v1013_v55, %v607_v49 }
  0x47   :  { %639 = vmatpush1.bf16.msra.mxu1 %v1170_v8  ;;  %v114_v41 = vpack.c.bf16 %v104_v58, %v104_v58  ;;  %v202_v8 = vsub.s32 1, %v1312_v34  ;;  %v1016_v34 = vld [vmem:[%s1413_s4] ss:$0 sm:$0xff] }
  0x48   :  { %640 = vmatprep.subr.bf16.mxu1 %v1174_v9  ;;  %v199_v9 = vrot.slane %v194_v7, %v198_v6 }
  0x49   :  { %682 = vmatpush1.bf16.msra.mxu0 %v1133_v62  ;;  %v1210_v62 = vld [vmem:[%s1412_s3 + $0x70] sm:$0xff]   ;;  %v203_v10 = vrot.slane %v194_v7, %v202_v8 }
  0x4a   :  { %683 = vmatprep.subr.bf16.mxu0 %v1137_v63  ;;  %v1211_v63 = vld [vmem:[%s1412_s3 + $0x30] sm:$0xff]  }
  0x4b   :  { %641 = vmatpush1.bf16.msra.mxu1 %v1176_v15 }
  0x4c   :  { %642 = vmatprep.subr.bf16.mxu1 %v1180_v17 }
  0x4d   :  { %684 = vmatpush1.bf16.msra.mxu0 %v1139_v0  ;;  %v1212_v0 = vld [vmem:[%s1412_s3 + $0x78] sm:$0xff]  }
  0x4e   :  { %685 = vmatprep.subr.bf16.mxu0 %v1143_v5 }
  0x4f   :  { %643 = vmatpush1.bf16.msra.mxu1 %v1182_v21 }
  0x50   :  { %644 = vmatprep.subr.bf16.mxu1 %v1186_v23 }
  0x51   :  { %686 = vmatpush1.bf16.msra.mxu0 %v1145_v12 }
  0x52   :  { %696 = vmatprep.subr.bf16.mxu0 %v1155_v13 }
  0x53   :  { %645 = vmatpush1.bf16.msra.mxu1 %v1188_v24 }
  0x54   :  { %688 = vmatmul.mubr.bf16.vlgmr.msra.gmra.mrb[0].mxu0 %v112_v16  ;;  %1033 = vmatprep.subr.bf16.mxu1 %v1198_v27 }
  0x55   :  { %697 = vmatpush1.bf16.msra.mxu0 %v1153_v18  ;;  %728 = vmatprep.mubr.bf16.mxu0 %v1266_v25 }
  0x56   :  { %698 = vmatprep.subr.bf16.mxu0 %v1161_v19  ;;  %647 = vmatmul.mubr.bf16.vlgmr.msra.gmra.mrb[0].mxu1 %v110_v30 }
  0x57   :  { %1034 = vmatpush3.bf16.msra.mxu1 %v1199_v31 }
  0x58   :  { %1035 = vmatprep.subr.bf16.mxu1 %v1200_v32 }
  0x59   :  { %699 = vmatpush1.bf16.msra.mxu0 %v1159_v20 }
  0x5a   :  { %700 = vmatprep.subr.bf16.mxu0 %v1167_v22 }
  0x5b   :  { %1036 = vmatpush3.bf16.msra.mxu1 %v1201_v36 }
  0x5c   :  { %1037 = vmatprep.subr.bf16.mxu1 %v1202_v37 }
  0x5d   :  { %701 = vmatpush1.bf16.msra.mxu0 %v1165_v28 }
  0x5e   :  { %702 = vmatprep.subr.bf16.mxu0 %v1173_v29 }
  0x5f   :  { %1038 = vmatpush3.bf16.msra.mxu1 %v1203_v43 }
  0x60   :  { %1039 = vmatprep.subr.bf16.mxu1 %v1204_v45 }
  0x61   :  { %703 = vmatpush1.bf16.msra.mxu0 %v1171_v33 }
  0x62   :  { %704 = vmatprep.subr.bf16.mxu0 %v1179_v35 }
  0x63   :  { %1040 = vmatpush3.bf16.msra.mxu1 %v1205_v50 }
  0x64   :  { %1041 = vmatprep.subr.bf16.mxu1 %v1206_v53 }
  0x65   :  { %705 = vmatpush1.bf16.msra.mxu0 %v1177_v38 }
  0x66   :  { %706 = vmatprep.subr.bf16.mxu0 %v1185_v39 }
  0x67   :  { %1042 = vmatpush3.bf16.msra.mxu1 %v1207_v57 }
  0x68   :  { %1043 = vmatprep.subr.bf16.mxu1 %v1208_v60 }
  0x69   :  { %707 = vmatpush1.bf16.msra.mxu0 %v1183_v46 }
  0x6a   :  { %708 = vmatprep.subr.bf16.mxu0 %v1191_v47 }
  0x6b   :  { %1044 = vmatpush3.bf16.msra.mxu1 %v1209_v61 }
  0x6c   :  { %1045 = vmatprep.subr.bf16.mxu1 %v1210_v62 }
  0x6d   :  { %709 = vmatpush1.bf16.msra.mxu0 %v1189_v54 }
  0x6e   :  { %710 = vmatprep.subr.bf16.mxu0 %v612_v56 }
  0x6f   :  { %1046 = vmatpush3.bf16.msra.mxu1 %v1211_v63 }
  0x70   :  { %1047 = vmatprep.subr.bf16.mxu1 %v1212_v0 }
  0x71   :  { %711 = vmatpush1.bf16.msra.mxu0 %v609_v59 }
  0x73   :  { %1048 = vmatpush3.bf16.msra.mxu1 %v1213_v1 }
  0x74   :  { %1015 = vmatmul.mubr.msk.bf16.vlgmr.msra.gmra.mrb[0].mxu0 %vm601_vm1, %v114_v41 }
 0x129   :  { %v648_v2 = vpop.f32.mrb[0].mxu1 }
 0x12a   :  { %v650_v3 = vpop.f32.mrb[1].mxu1  ;;  %v649_v11 = vadd.f32 %v648_v2, %v199_v9 }
 0x12b   :  { %v652_v4 = vpop.f32.mrb[2].mxu1  ;;  %v651_v12 = vadd.f32 %v650_v3, %v203_v10 }
 0x12c   :  { %v653_v5 = vpop.f32.mrb[3].mxu1 }
 0x147   :  { %v730_v13 = vpop.f32.mrb[0].mxu0 }
 0x148   :  { %v1056_v14 = vadd.f32 %v730_v13, %v649_v11  ;;  %v732_v15 = vpop.f32.mrb[1].mxu0 }
 0x149   :  { %v1058_v16 = vadd.f32 %v732_v15, %v651_v12  ;;  %v734_v17 = vpop.f32.mrb[2].mxu0 }
 0x14a   :  { %v737_v18 = vmax.f32 %v1056_v14, 0.0  ;;  %v735_v19 = vpop.f32.mrb[3].mxu0 }
 0x14b   :  { %v738_v20 = vmax.f32 %v1058_v16, 0.0 }
 0x14c   :  { %v739_v22 = vpack.c.bf16 %v737_v18, %v737_v18 }
 0x14d   :  { %v740_v21 = vpack.c.bf16 %v738_v20, %v738_v20 }
 0x14f   :  { %908 = vmatprep.mubr.bf16.mxu1 %v740_v21 }
 0x150   :  { %909 = vmatmul.mubr.bf16.vlgmr.msra.gmra.mrb[4].mxu1 %v739_v22 }
 0x223   :  { %v1049_v23 = vpop.f32.mrb[4].mxu1 }
 0x224   :  { %v1050_v24 = vpop.f32.mrb[5].mxu1 }
 0x225   :  { %v1051_v25 = vadd.f32 %v1050_v24, %v1049_v23  ;;  %v1052_v26 = vpop.f32.mrb[6].mxu1 }
 0x226   :  { %v1053_v27 = vpop.f32.mrb[7].mxu1 }
 0x227   :  { %v911_v28 = vadd.f32 %v1051_v25, %v1016_v34 }
 0x229   :  { %v916_v29 = vmax.f32 %v911_v28, 0.0 }
 0x22b   :  { %917 = vst [vmem:[#allocation5] sm:$0xff] %v916_v29 }
 0x22c   :  { %922 = vsyncadd [#allocation4], 96  ;;  %s1267_s25 = smov [#allocation5]  }
 0x22d   :  { %s923_s26 = sshll.u32 %s1267_s25, 4  ;;  %s924_s26 = int_to_ptr.vmem [resolvable:$true] %s923_s26 }
 0x22e   :  { %s1236_s27 = scalar_lea.vmem %s924_s26, 32  ;;  %s1240_s28 = scalar_lea.vmem %s924_s26, 128 }
 0x22f   :  { %p1237_p8 = scmp.ne.s32.totalorder %s924_s26, %s1236_s27  ;;  %p1241_p9 = scmp.lt.s32.totalorder %s924_s26, %s924_s26 }
 0x230   :  { %p1242_p10 = scmp.lt.s32.totalorder %s1240_s28, %s1236_s27 }
 0x232   :  { %p1243_p11 = por %p1242_p10, %p1241_p9 }
 0x234   :  { %p1244_p12 = pnand %p1243_p11, %p1237_p8 }
 0x236   :  { %1247 = shalt.err (!%p1244_p12)
}
 0x237   :  { %s1248_s30 = scalar_lea.hbm %s1414_s5, 32 }
 0x238   :  { %p1249_p13 = scmp.ne.s32.totalorder %s1414_s5, %s1248_s30  ;;  %p1252_p0 = scmp.lt.u32.totalorder %s1248_s30, %s1414_s5 }
 0x23a   :  { %p1254_p1 = pnand %p1252_p0, %p1249_p13 }
 0x23c   :  { %1257 = shalt.err (!%p1254_p1)
}
 0x23d   :  { %s1268_s8 = smov 32   ;;  %s1269_s9 = smov 2  }
 0x23e   :  { %929 = dma.vmem_to_hbm [thread:$0]  %s924_s26, 32, %s1414_s5, [#allocation4], %s1268_s8, %s1268_s8, %s1269_s9  }
 0x23f   :  { %1260 = dma.done.wait [#allocation4], 128  }
 0x240   :  { %1261 = vsyncadd [#allocation4], 4294967168 }
 0x241   :  { %933 = vsyncpa [#allocation3], 1 }
 0x242   :  { %934 = vsyncpa [#allocation4], 1 }

</bundles_post_ra>
